<compile_context>
chip_gen: v7x
topology: tpu7x:2x2x1
jax: 0.10.0
libtpu: 0.0.40
codegen_flags: <defaults>
</compile_context>

<pallas_src>
import functools

import jax
import jax.numpy as jnp
from jax.experimental import pallas as pl
from jax.experimental.pallas import tpu as pltpu


def _round_up(x, m):
    return (x + m - 1) // m * m


def _cdiv(a, b):
    return (a + b - 1) // b


def _chip_defaults():
    """Per-generation row tile, mid tile and VMEM limit."""
    kind = ""
    try:
        kind = jax.devices()[0].device_kind.lower()
    except Exception:
        pass
    if "v7" in kind or "tpu7" in kind:
        # 64 MiB VMEM per TensorCore, 2 TCs/chip.
        return {"tm": 512, "tmid": 256, "vmem_limit": 52 << 20}
    if "v6" in kind:
        return {"tm": 1024, "tmid": 512, "vmem_limit": 100 << 20}
    if "v5e" in kind or "v5 lite" in kind or "v5litepod" in kind:
        return {"tm": 512, "tmid": 512, "vmem_limit": 96 << 20}
    if "v5" in kind or "v4" in kind:
        return {"tm": 512, "tmid": 512, "vmem_limit": 96 << 20}
    # Unknown chip: budget sized for the smallest VMEM generation (v7x).
    return {"tm": 512, "tmid": 256, "vmem_limit": 48 << 20}


def _aligned_divisor(n, target, align=128):
    """Largest multiple-of-`align` divisor of n that is <= target, else the
    smallest multiple-of-`align` divisor, else n itself."""
    best_le, best_gt = None, None
    d = align
    while d <= n:
        if n % d == 0:
            if d <= target:
                best_le = d
            elif best_gt is None:
                best_gt = d
        d += align
    if best_le is not None:
        return best_le
    if best_gt is not None:
        return best_gt
    return n


def _vmem_resident_bytes(tm, H, mid, cd_bytes, io_bytes):
    return (2 * 2 * H * mid * cd_bytes        # W1 + W2 (double-buffer budget)
            + 2 * tm * H * io_bytes           # x tiles
            + 2 * tm * H * io_bytes           # out tiles
            + tm * mid * (4 + cd_bytes)       # h intermediate (f32 + cast copy)
            + 4 * (mid + H) * 4)              # biases (f32)


def _vmem_streamed_bytes(tm, tmid, H, cd_bytes, io_bytes):
    return (2 * 2 * H * tmid * cd_bytes       # W1/W2 slabs (double-buffered)
            + 2 * tm * H * io_bytes           # x tiles
            + 2 * tm * H * io_bytes           # out tiles
            + tm * tmid * (4 + cd_bytes)      # h slab intermediate
            + tm * H * 4                      # f32 accumulator scratch
            + 4 * (tmid + H) * 4)             # biases


# ----------------------------------------------------------------------------
# Kernels
# ----------------------------------------------------------------------------

def _ffn_kernel_resident(x_ref, w1_ref, b1_ref, w2_ref, b2_ref, o_ref):
    """Weights fully VMEM-resident; 1-D grid over row tiles."""
    cdt = w1_ref.dtype
    h = jnp.dot(x_ref[...].astype(cdt), w1_ref[...],
                preferred_element_type=jnp.float32)
    h = jnp.maximum(h + b1_ref[...], 0.0)
    # TODO(synk): dropout(p=0.1) omitted — eval-mode identity (no RNG mask).
    o = jnp.dot(h.astype(cdt), w2_ref[...], preferred_element_type=jnp.float32)
    o_ref[...] = (o + b2_ref[...]).astype(o_ref.dtype)


def _ffn_kernel_streamed(x_ref, w1_ref, b1_ref, w2_ref, b2_ref, o_ref, acc_ref):
    """Mid (4H) axis tiled as the last grid axis; f32 accumulator in VMEM."""
    j = pl.program_id(1)
    cdt = w1_ref.dtype

    @pl.when(j == 0)
    def _():
        # Fold b2 into the accumulator init (saves a VPU pass in the epilogue).
        acc_ref[...] = jnp.broadcast_to(b2_ref[...], acc_ref.shape)

    h = jnp.dot(x_ref[...].astype(cdt), w1_ref[...],
                preferred_element_type=jnp.float32)
    h = jnp.maximum(h + b1_ref[...], 0.0)
    # TODO(synk): dropout(p=0.1) omitted — eval-mode identity (no RNG mask).
    acc_ref[...] += jnp.dot(h.astype(cdt), w2_ref[...],
                            preferred_element_type=jnp.float32)

    @pl.when(j == pl.num_programs(1) - 1)
    def _():
        o_ref[...] = acc_ref[...].astype(o_ref.dtype)


# ----------------------------------------------------------------------------
# Wrapper
# ----------------------------------------------------------------------------

@functools.partial(
    jax.jit,
    static_argnames=("tm", "tmid", "vmem_limit", "compute_dtype", "force_stream"))
def _ffn_forward_impl(x, w1, b1, w2, b2, *, tm, tmid, vmem_limit, compute_dtype,
                      force_stream):
    B, S, H = x.shape
    mid = w1.shape[1]
    M = B * S
    cd = jnp.dtype(compute_dtype)
    cd_bytes = cd.itemsize
    io_bytes = x.dtype.itemsize

    # ---- Row tile ----------------------------------------------------------
    tm_eff = min(tm, _round_up(M, 8))
    # Guarantee >= 2 row tiles when there is enough work, so the "parallel"
    # axis actually splits across v7x's two TensorCores (and gives the
    # pipeline something to overlap on single-core chips).
    if M > 8 and _cdiv(M, tm_eff) < 2:
        tm_eff = _round_up(_cdiv(M, 2), 8)
    # Prefer a near-by row tile that divides M exactly (skips the pad copy).
    if M % tm_eff != 0:
        for cand in range(tm_eff, max(tm_eff // 2, 8) - 1, -8):
            if M % cand == 0:
                tm_eff = cand
                break

    # ---- Weight residency decision ------------------------------------------
    budget = int(0.85 * vmem_limit)
    resident = (not force_stream and
                _vmem_resident_bytes(tm_eff, H, mid, cd_bytes, io_bytes) <= budget)
    if not resident:
        tmid_eff = _aligned_divisor(mid, tmid)
        # Shrink the row tile until the streamed estimate fits the budget.
        while (tm_eff > 8 and
               _vmem_streamed_bytes(tm_eff, tmid_eff, H, cd_bytes, io_bytes) > budget):
            tm_eff = max(8, _round_up(tm_eff // 2, 8))

    M_pad = _round_up(M, tm_eff)
    grid_m = M_pad // tm_eff

    # ---- Operand prep (x stays in its own dtype; cast happens in-kernel) ----
    x2d = x.reshape(M, H)
    if M_pad != M:
        x2d = jnp.pad(x2d, ((0, M_pad - M), (0, 0)))

    # No-ops when weights are already stored in the compute dtype.
    w1c = w1.astype(cd)
    w2c = w2.astype(cd)
    b1_2d = b1.reshape(1, mid).astype(jnp.float32)
    b2_2d = b2.reshape(1, H).astype(jnp.float32)

    w_streams = 1 if resident else grid_m
    cost = pl.CostEstimate(
        flops=4 * M_pad * H * mid,                      # two matmuls
        transcendentals=0,
        bytes_accessed=(M_pad * H * io_bytes            # x
                        + w_streams * 2 * H * mid * cd_bytes   # W1 + W2
                        + (mid + H) * 4                 # biases
                        + M_pad * H * io_bytes),        # output
    )

    if resident:
        out2d = pl.pallas_call(
            _ffn_kernel_resident,
            out_shape=jax.ShapeDtypeStruct((M_pad, H), x.dtype),
            grid_spec=pltpu.PrefetchScalarGridSpec(
                num_scalar_prefetch=0,
                grid=(grid_m,),
                in_specs=[
                    pl.BlockSpec((tm_eff, H), lambda i: (i, 0)),   # x tile
                    pl.BlockSpec((H, mid), lambda i: (0, 0)),      # W1 (resident)
                    pl.BlockSpec((1, mid), lambda i: (0, 0)),      # b1
                    pl.BlockSpec((mid, H), lambda i: (0, 0)),      # W2 (resident)
                    pl.BlockSpec((1, H), lambda i: (0, 0)),        # b2
                ],
                out_specs=pl.BlockSpec((tm_eff, H), lambda i: (i, 0)),
            ),
            compiler_params=pltpu.CompilerParams(
                dimension_semantics=("parallel",),
                vmem_limit_bytes=vmem_limit,
            ),
            cost_estimate=cost,
        )(x2d, w1c, b1_2d, w2c, b2_2d)
    else:
        n_mid = mid // tmid_eff
        out2d = pl.pallas_call(
            _ffn_kernel_streamed,
            out_shape=jax.ShapeDtypeStruct((M_pad, H), x.dtype),
            grid_spec=pltpu.PrefetchScalarGridSpec(
                num_scalar_prefetch=0,
                grid=(grid_m, n_mid),
                in_specs=[
                    pl.BlockSpec((tm_eff, H), lambda i, j: (i, 0)),      # x tile
                    pl.BlockSpec((H, tmid_eff), lambda i, j: (0, j)),    # W1 slab
                    pl.BlockSpec((1, tmid_eff), lambda i, j: (0, j)),    # b1 slab
                    pl.BlockSpec((tmid_eff, H), lambda i, j: (j, 0)),    # W2 slab
                    pl.BlockSpec((1, H), lambda i, j: (0, 0)),           # b2
                ],
                out_specs=pl.BlockSpec((tm_eff, H), lambda i, j: (i, 0)),
                scratch_shapes=[pltpu.VMEM((tm_eff, H), jnp.float32)],
            ),
            compiler_params=pltpu.CompilerParams(
                dimension_semantics=("parallel", "arbitrary"),
                vmem_limit_bytes=vmem_limit,
            ),
            cost_estimate=cost,
        )(x2d, w1c, b1_2d, w2c, b2_2d)

    return out2d[:M].reshape(B, S, H)


def ffn_forward(x, w1, b1, w2, b2, *, tm=None, tmid=None,
                compute_dtype=jnp.bfloat16, force_stream=False):
    """x: (B, S, H). Returns (B, S, H) in x.dtype.

    Matmuls run in `compute_dtype` on the MXU with f32 accumulation; bias adds
    and the accumulator stay f32.  Store weights pre-cast to `compute_dtype`
    to avoid a per-call HBM cast pass.
    """
    cfg = _chip_defaults()
    return _ffn_forward_impl(
        x, w1, b1, w2, b2,
        tm=int(tm) if tm is not None else int(cfg["tm"]),
        tmid=int(tmid) if tmid is not None else int(cfg["tmid"]),
        vmem_limit=int(cfg["vmem_limit"]),
        compute_dtype=jnp.dtype(compute_dtype),
        force_stream=bool(force_stream),
    )


# ----------------------------------------------------------------------------
# Reference / init helpers
# ----------------------------------------------------------------------------

def init_ffn_params(key, hidden_size, dtype=jnp.float32):
    """Deterministic init matching the shapes of nn.Linear layers in MLP."""
    mid = hidden_size * 4
    k1, k2, k3, k4 = jax.random.split(key, 4)
    # PyTorch nn.Linear default: U(-1/sqrt(fan_in), 1/sqrt(fan_in)).
    lim1 = 1.0 / jnp.sqrt(hidden_size)
    lim2 = 1.0 / jnp.sqrt(mid)
    w1 = jax.random.uniform(k1, (hidden_size, mid), dtype, -lim1, lim1)
    b1 = jax.random.uniform(k2, (mid,), dtype, -lim1, lim1)
    w2 = jax.random.uniform(k3, (mid, hidden_size), dtype, -lim2, lim2)
    b2 = jax.random.uniform(k4, (hidden_size,), dtype, -lim2, lim2)
    return w1, b1, w2, b2


def ffn_reference(x, w1, b1, w2, b2):
    h = jnp.maximum(x @ w1 + b1, 0.0)
    return h @ w2 + b2


if __name__ == "__main__":
    key = jax.random.PRNGKey(0)
    kx, kp = jax.random.split(key)

    # --- Demo 1: H = 32 (mid = 128) -> weight-resident path -----------------
    B, S, H = 2, 8, 32
    x = jax.random.normal(kx, (B, S, H), jnp.float32)
    w1, b1, w2, b2 = init_ffn_params(kp, H)
    ref = ffn_reference(x, w1, b1, w2, b2)

    # Full-precision path (f32 operands) — tight check against the reference.
    out_f32 = jax.block_until_ready(
        ffn_forward(x, w1, b1, w2, b2, compute_dtype=jnp.float32))
    assert out_f32.shape == (B, S, H)
    assert jnp.allclose(out_f32, ref, atol=1e-5, rtol=1e-5), "f32 mismatch vs reference"

    # Default performance path: bf16 operands pre-cast ONCE (no per-call cast).
    w1_bf = w1.astype(jnp.bfloat16)
    w2_bf = w2.astype(jnp.bfloat16)
    out_bf16 = jax.block_until_ready(ffn_forward(x, w1_bf, b1, w2_bf, b2))
    assert out_bf16.shape == (B, S, H)
    assert jnp.allclose(out_bf16, ref, atol=3e-2, rtol=3e-2), "bf16 mismatch vs reference"

    # --- Demo 2: H = 64 (mid = 256) forcing the streamed / accumulation path -
    kx2, kp2 = jax.random.split(jax.random.PRNGKey(1))
    B2, S2, H2 = 2, 8, 64
    x2 = jax.random.normal(kx2, (B2, S2, H2), jnp.float32)
    p2 = init_ffn_params(kp2, H2)
    ref2 = ffn_reference(x2, *p2)
    out2 = jax.block_until_ready(
        ffn_forward(x2, *p2, compute_dtype=jnp.float32, tmid=128,
                    force_stream=True))
    assert out2.shape == (B2, S2, H2)
    assert jnp.allclose(out2, ref2, atol=1e-4, rtol=1e-4), "streamed-path mismatch"

    print("KERNEL_OK")
</pallas_src>

<mosaic_0001>
module attributes {stable_mosaic.version = 11 : i64} {
  func.func @_ffn_kernel_resident(%arg0: i32, %arg1: memref<8x32xf32, #tpu.memory_space<vmem>>, %arg2: memref<32x128xf32, #tpu.memory_space<vmem>>, %arg3: memref<1x128xf32, #tpu.memory_space<vmem>>, %arg4: memref<128x32xf32, #tpu.memory_space<vmem>>, %arg5: memref<1x32xf32, #tpu.memory_space<vmem>>, %arg6: memref<8x32xf32, #tpu.memory_space<vmem>>) attributes {dimension_semantics = [#tpu.dimension_semantics<parallel>], iteration_bounds = array<i64: 2>, scalar_prefetch = 0 : i64, scratch_operands = 0 : i64, tpu.core_type = #tpu.core_type<tc>, window_params = [{transform_indices = @transform_0, window_bounds = array<i64: 8, 32>}, {pipeline_mode = #tpu.pipeline_mode<synchronous>, transform_indices = @transform_1, window_bounds = array<i64: 32, 128>}, {pipeline_mode = #tpu.pipeline_mode<synchronous>, transform_indices = @transform_2, window_bounds = array<i64: 1, 128>}, {pipeline_mode = #tpu.pipeline_mode<synchronous>, transform_indices = @transform_3, window_bounds = array<i64: 128, 32>}, {pipeline_mode = #tpu.pipeline_mode<synchronous>, transform_indices = @transform_4, window_bounds = array<i64: 1, 32>}, {transform_indices = @transform_5, window_bounds = array<i64: 8, 32>}]} {
    %c0 = arith.constant 0 : index
    %c0_0 = arith.constant 0 : index
    %0 = vector.load %arg1[%c0, %c0_0] : memref<8x32xf32, #tpu.memory_space<vmem>>, vector<8x32xf32>
    %c0_1 = arith.constant 0 : index
    %c0_2 = arith.constant 0 : index
    %1 = vector.load %arg2[%c0_1, %c0_2] : memref<32x128xf32, #tpu.memory_space<vmem>>, vector<32x128xf32>
    %cst = arith.constant dense<0.000000e+00> : vector<8x128xf32>
    %2 = tpu.matmul %0, %1, %cst {dimension_numbers = #tpu.dot_dimension_numbers<[1], [0], [0], [1], [0, 0, 1, 1], [], []>} : vector<8x32xf32>, vector<32x128xf32>, vector<8x128xf32> -> vector<8x128xf32>
    %c0_3 = arith.constant 0 : index
    %c0_4 = arith.constant 0 : index
    %3 = vector.load %arg3[%c0_3, %c0_4] : memref<1x128xf32, #tpu.memory_space<vmem>>, vector<1x128xf32>
    %4 = vector.broadcast %3 : vector<1x128xf32> to vector<8x128xf32>
    %5 = arith.addf %2, %4 : vector<8x128xf32>
    %cst_5 = arith.constant 0.000000e+00 : f32
    %6 = vector.broadcast %cst_5 : f32 to vector<8x128xf32>
    %7 = arith.maximumf %5, %6 : vector<8x128xf32>
    %c0_6 = arith.constant 0 : index
    %c0_7 = arith.constant 0 : index
    %8 = vector.load %arg4[%c0_6, %c0_7] : memref<128x32xf32, #tpu.memory_space<vmem>>, vector<128x32xf32>
    %cst_8 = arith.constant dense<0.000000e+00> : vector<8x32xf32>
    %9 = tpu.matmul %7, %8, %cst_8 {dimension_numbers = #tpu.dot_dimension_numbers<[1], [0], [0], [1], [0, 0, 1, 1], [], []>} : vector<8x128xf32>, vector<128x32xf32>, vector<8x32xf32> -> vector<8x32xf32>
    %c0_9 = arith.constant 0 : index
    %c0_10 = arith.constant 0 : index
    %10 = vector.load %arg5[%c0_9, %c0_10] : memref<1x32xf32, #tpu.memory_space<vmem>>, vector<1x32xf32>
    %11 = vector.broadcast %10 : vector<1x32xf32> to vector<8x32xf32>
    %12 = arith.addf %9, %11 : vector<8x32xf32>
    %c0_11 = arith.constant 0 : index
    %c0_12 = arith.constant 0 : index
    %13 = vector.load %arg6[%c0_11, %c0_12] : memref<8x32xf32, #tpu.memory_space<vmem>>, vector<8x32xf32>
    tpu.vector_store %arg6[%c0_11, %c0_12], %12 {strides = array<i32>} : memref<8x32xf32, #tpu.memory_space<vmem>>, vector<8x32xf32>,
    return
  }
  func.func @transform_0(%arg0: i32) -> (i32, i32) {
    %c0_i32 = arith.constant 0 : i32
    %c0_i32_0 = arith.constant 0 : i32
    return %arg0, %c0_i32 : i32, i32
  }
  func.func @transform_1(%arg0: i32) -> (i32, i32) {
    %c0_i32 = arith.constant 0 : i32
    %c0_i32_0 = arith.constant 0 : i32
    %c0_i32_1 = arith.constant 0 : i32
    return %c0_i32, %c0_i32_0 : i32, i32
  }
  func.func @transform_2(%arg0: i32) -> (i32, i32) {
    %c0_i32 = arith.constant 0 : i32
    %c0_i32_0 = arith.constant 0 : i32
    %c0_i32_1 = arith.constant 0 : i32
    return %c0_i32, %c0_i32_0 : i32, i32
  }
  func.func @transform_3(%arg0: i32) -> (i32, i32) {
    %c0_i32 = arith.constant 0 : i32
    %c0_i32_0 = arith.constant 0 : i32
    %c0_i32_1 = arith.constant 0 : i32
    return %c0_i32, %c0_i32_0 : i32, i32
  }
  func.func @transform_4(%arg0: i32) -> (i32, i32) {
    %c0_i32 = arith.constant 0 : i32
    %c0_i32_0 = arith.constant 0 : i32
    %c0_i32_1 = arith.constant 0 : i32
    return %c0_i32, %c0_i32_0 : i32, i32
  }
  func.func @transform_5(%arg0: i32) -> (i32, i32) {
    %c0_i32 = arith.constant 0 : i32
    %c0_i32_0 = arith.constant 0 : i32
    return %arg0, %c0_i32 : i32, i32
  }
}

</mosaic_0001>

<bundles_post_ra>
// kernel: _ffn_forward_impl.1
= control target key start
LH: loop header
LB: loop body
LE: loop exit
PB: predicated region body
PF: predicated region fallthrough
CT: control target
= control target key end

     0   :  { %10 = vsyncpa [#allocation3], 0  ;;  %s893_s0 = inlined_call_operand.vmem [shape: f32[16,32], index: 0, kind: input, shape index: {}]   ;;  %s894_s1 = inlined_call_operand.vmem [shape: f32[32,128], index: 1, kind: input, shape index: {}]   ;;  %s895_s2 = inlined_call_operand.vmem [shape: f32[1,128], index: 2, kind: input, shape index: {}]   ;;  %s896_s3 = inlined_call_operand.vmem [shape: f32[128,32], index: 3, kind: input, shape index: {}]   ;;  %s897_s4 = inlined_call_operand.vmem [shape: f32[1,32], index: 4, kind: input, shape index: {}]   ;;  %s898_s5 = inlined_call_operand.hbm [shape: f32[16,32], index: 5, kind: output, shape index: {}]  }
   0x1   :  { %12 = vsyncpa [#allocation3 + $0x1], 0  ;;  %s725_s18 = smov 0   ;;  %s727_s19 = smov 0  }
   0x2   :  { %s729_s20 = smov 0   ;;  %s731_s21 = smov 0  }
   0x3 LB: > { %s746_s22 = sadd.s32 4294967295, %s689_s21   ;;  %s474_s23 = sadd.s32 4294967294, %s689_s21   ;;  %s689_s21 = sphi %s731_s21, %s904_s21   ;;  %s685_s20 = sphi %s729_s20, %s903_s20   ;;  %s681_s19 = sphi %s727_s19, %s902_s19   ;;  %s677_s18 = sphi %s725_s18, %s901_s18  }
   0x4   : > { %s750_s24 = sadd.s32 1, %s689_s21   ;;  %s135_s25 = sadd.s32 1, %s685_s20 }
   0x5   : > { %s132_s26 = ssub.s32 %s689_s21, %s750_s24  ;;  %p145_p0 = scmp.ne.s32.totalorder %s685_s20, %s681_s19 }
   0x6   : > { %p133_p1 = scmp.eq.s32.totalorder %s132_s26, 0  ;;  %p146_p2 = scmp.eq.s32.totalorder %s746_s22, 1 }
   0x7   : > { %p151_p3 = scmp.ne.s32.totalorder %s681_s19, %s677_s18  ;;  %p152_p4 = scmp.eq.s32.totalorder %s474_s23, 1 }
   0x8   : > { %s761_s27 = scalar_select %p133_p1, %s685_s20, %s135_s25  }
   0x9   : > { %p763_p5 = por %p146_p2, %p145_p0  ;;  %p767_p6 = por %p152_p4, %p151_p3 }
   0xa   : > { %p477_p7 = scmp.ge.s32.totalorder %s689_s21, 1  ;;  %p189_p8 = scmp.lt.s32.totalorder %s689_s21, 3 }
   0xc   : > { %p190_p9 = pnand %p477_p7, %p189_p8 }
   0xd   : > { %v221_v0 = vld [vmem:[%s894_s1] sm:$0xff] (!%p190_p9)  ;;  %v222_v1 = vld [vmem:[%s894_s1 + $0x8] sm:$0xff] (!%p190_p9)  ;;  %v223_v2 = vld [vmem:[%s894_s1 + $0x10] sm:$0xff] (!%p190_p9)  ;;  %v691_v3 = vmov (!%p190_p9), 0.0|0.0   ;;  %vm692_vm0 = vmmov (!%p190_p9), 0   ;;  %v693_v6 = vmov (!%p190_p9), 0.0  }
   0xe   : > { %193 = sbr.rel (%p190_p9) target bundleno = 470 (0x1d6), region = 40  ;;  %555 = vmatprep.subr.bf16.mxu0 (!%p190_p9), %v691_v3  ;;  %v556_v4 = vpack.c.bf16 (!%p190_p9), %v222_v1, %v221_v0  ;;  %v224_v5 = vld [vmem:[%s894_s1 + $0x18] sm:$0xff] (!%p190_p9)  ;;  %517 = vmatprep.mubr.msk.f32.mxu0 (!%p190_p9), %vm692_vm0, %v693_v6  ;;  %p216_p10 = scmp.lt.s32.totalorder (!%p190_p9), %s746_s22, 1  ;;  %v307_v7 = vld [vmem:[%s896_s3] sm:$0xff] (!%p190_p9)  ;;  %v308_v8 = vld [vmem:[%s896_s3 + $0x8] sm:$0xff] (!%p190_p9)  ;;  %vm232_vm1 = vcmask (!%p190_p9), 261120  }
   0xf   : > { %561 = vmatprep.subr.bf16.mxu1 (!%p190_p9), %v691_v3  ;;  %v562_v9 = vpack.c.bf16 (!%p190_p9), %v308_v8, %v307_v7  ;;  %v309_v10 = vld [vmem:[%s896_s3 + $0x10] sm:$0xff] (!%p190_p9)  ;;  %v310_v11 = vld [vmem:[%s896_s3 + $0x18] sm:$0xff] (!%p190_p9)  ;;  %552 = vmatprep.mubr.msk.f32.mxu1 (!%p190_p9), %vm692_vm0, %v693_v6  ;;  %v559_v12 = vpack.c.bf16 (!%p190_p9), %v224_v5, %v223_v2  ;;  %v311_v14 = vld [vmem:[%s896_s3 + $0x20] sm:$0xff] (!%p190_p9)  ;;  %s213_s26 = sand.u32 (!%p190_p9), 1, %s681_s19   ;;  %s484_s8 = sshll.u32 (!%p190_p9), %s746_s22, 7 }
  0x10   : > { %557 = vmatpush3.bf16.msra.mxu0 (!%p190_p9), %v556_v4  ;;  %v565_v13 = vpack.c.bf16 (!%p190_p9), %v310_v11, %v309_v10  ;;  %v312_v15 = vld [vmem:[%s896_s3 + $0x28] sm:$0xff] (!%p190_p9)  ;;  %v313_v18 = vld [vmem:[%s896_s3 + $0x30] sm:$0xff] (!%p190_p9)  ;;  %v314_v19 = vld [vmem:[%s896_s3 + $0x38] sm:$0xff] (!%p190_p9)  ;;  %s402_s14 = scalar_lea.sflag (!%p190_p9), [#allocation3], %s213_s26 }
  0x11   : > { %558 = vmatprep.subr.bf16.mxu0 (!%p190_p9), %v691_v3  ;;  %563 = vmatpush3.bf16.msra.mxu1 (!%p190_p9), %v562_v9  ;;  %v568_v17 = vpack.c.bf16 (!%p190_p9), %v312_v15, %v311_v14  ;;  %v571_v20 = vpack.c.bf16 (!%p190_p9), %v314_v19, %v313_v18  ;;  %v315_v21 = vld [vmem:[%s896_s3 + $0x40] sm:$0xff] (!%p190_p9)  ;;  %v316_v22 = vld [vmem:[%s896_s3 + $0x48] sm:$0xff] (!%p190_p9)  ;;  %v317_v24 = vld [vmem:[%s896_s3 + $0x50] sm:$0xff] (!%p190_p9) }
  0x12   : > { %564 = vmatprep.subr.bf16.mxu1 (!%p190_p9), %v691_v3  ;;  %v574_v23 = vpack.c.bf16 (!%p190_p9), %v316_v22, %v315_v21  ;;  %v318_v25 = vld [vmem:[%s896_s3 + $0x58] sm:$0xff] (!%p190_p9)  ;;  %v319_v27 = vld [vmem:[%s896_s3 + $0x60] sm:$0xff] (!%p190_p9)  ;;  %v320_v28 = vld [vmem:[%s896_s3 + $0x68] sm:$0xff] (!%p190_p9) }
  0x13   : > { %v577_v26 = vpack.c.bf16 (!%p190_p9), %v318_v25, %v317_v24  ;;  %v580_v29 = vpack.c.bf16 (!%p190_p9), %v320_v28, %v319_v27  ;;  %v321_v30 = vld [vmem:[%s896_s3 + $0x70] sm:$0xff] (!%p190_p9)  ;;  %v322_v31 = vld [vmem:[%s896_s3 + $0x78] sm:$0xff] (!%p190_p9)  ;;  %v480_v33 = vld [vmem:[%s895_s2] ss:$0 sm:$0xff] (!%p190_p9) }
  0x14   : > { %560 = vmatpush3.bf16.msra.mxu0 (!%p190_p9), %v559_v12  ;;  %v583_v32 = vpack.c.bf16 (!%p190_p9), %v322_v31, %v321_v30  ;;  %v482_v38 = vld [vmem:[%s897_s4] ss:$0 sm:$0xff] (!%p190_p9) }
  0x15   : > { %s217_s30 = scalar_select %p216_p10, %s746_s22, 1  ;;  %566 = vmatpush3.bf16.msra.mxu1 %v565_v13 }
  0x16   : > { %567 = vmatprep.subr.bf16.mxu1 %v691_v3  ;;  %s694_s22 = smov [#allocation2]  }
  0x17   : > { %s479_s6 = sshll.u32 %s217_s30, 3  ;;  %s478_s30 = sshll.u32 %s213_s26, 3 }
  0x18   : > { %s219_s13 = scalar_lea.vmem %s893_s0, %s479_s6  ;;  %s215_s9 = scalar_lea.vmem [#allocation2], %s478_s30 }
  0x19   : > { %v220_v16 = vld [vmem:[%s219_s13] sm:$0xff]  ;;  %569 = vmatpush3.bf16.msra.mxu1 %v568_v17  ;;  %s415_s10 = sshll.u32 %s215_s9, 4  ;;  %s850_s13 = scalar_lea.hbm %s898_s5, %s484_s8  ;;  %s852_s10 = int_to_ptr.vmem [resolvable:$true] %s415_s10 }
  0x1a   : > { %518 = vmatmul.mubr.msk.f32.vlgmr.msra.gmra.mrb[0].mxu0 %vm232_vm1, %v220_v16  ;;  %570 = vmatprep.subr.bf16.mxu1 %v691_v3  ;;  %s627_s15 = scalar_lea.vmem %s852_s10, 128  ;;  %s631_s16 = sshll.u32 %s694_s22, 4  ;;  %s632_s16 = int_to_ptr.vmem [resolvable:$false] %s631_s16 }
  0x1b   : > { %p628_p11 = scmp.ne.s32.totalorder %s852_s10, %s627_s15  ;;  %s633_s17 = scalar_lea.vmem %s632_s16, 256 }
  0x1c   : > { %p634_p0 = scmp.lt.s32.totalorder %s852_s10, %s632_s16  ;;  %p635_p1 = scmp.lt.s32.totalorder %s633_s17, %s627_s15 }
  0x1d   : > { %572 = vmatpush3.bf16.msra.mxu1 %v571_v20  ;;  %p629_p12 = pnand %p628_p11, %p763_p5 }
  0x1e   : > { %573 = vmatprep.subr.bf16.mxu1 %v691_v3  ;;  %p636_p2 = por %p635_p1, %p634_p0 }
  0x1f   : > { %p630_p13 = pneg %p629_p12 }
  0x21   : > { %575 = vmatpush3.bf16.msra.mxu1 %v574_v23  ;;  %p637_p3 = pnand %p636_p2, %p630_p13 }
  0x22   : > { %576 = vmatprep.subr.bf16.mxu1 %v691_v3 }
  0x25   : > { %578 = vmatpush3.bf16.msra.mxu1 %v577_v26 }
  0x26   : > { %579 = vmatprep.subr.bf16.mxu1 %v691_v3 }
  0x29   : > { %581 = vmatpush3.bf16.msra.mxu1 %v580_v29 }
  0x2a   : > { %582 = vmatprep.subr.bf16.mxu1 %v691_v3 }
  0x2d   : > { %584 = vmatpush3.bf16.msra.mxu1 %v583_v32 }
  0xed   : > { %v302_v34 = vpop.f32.mrb[0].mxu0 }
  0xee   : > { %v303_v35 = vadd.f32 %v480_v33, %v302_v34  ;;  %v519_v36 = vpop.f32.mrb[1].mxu0 }
  0xf0   : > { %v306_v37 = vmax.f32 %v303_v35, 0.0 }
  0xf2   : > { %553 = vmatmul.mubr.f32.vlgmr.msra.gmra.mrb[0].mxu1 %v306_v37 }
 0x1c5   : > { %v396_v39 = vpop.f32.mrb[0].mxu1 }
 0x1c6   : > { %v397_v40 = vadd.f32 %v482_v38, %v396_v39  ;;  %v554_v41 = vpop.f32.mrb[1].mxu1 }
 0x1c8   : > { %400 = vst.msk [vmem:[%s215_s9] sm:$0xff] %vm232_vm1, %v397_v40 }
 0x1c9   : > { %640 = shalt.err (!%p637_p3)
}
 0x1ca   : > { %s641_s23 = scalar_lea.hbm %s850_s13, 128  ;;  %s645_s30 = scalar_lea.hbm %s898_s5, 256 }
 0x1cb   : > { %p642_p4 = scmp.ne.s32.totalorder %s850_s13, %s641_s23  ;;  %p646_p9 = scmp.lt.u32.totalorder %s850_s13, %s898_s5 }
 0x1cc   : > { %p647_p10 = scmp.lt.u32.totalorder %s645_s30, %s641_s23  ;;  %p649_p12 = scmp.lt.u32.totalorder %s641_s23, %s850_s13 }
 0x1cd   : > { %p643_p7 = pnand %p642_p4, %p763_p5 }
 0x1ce   : > { %p648_p11 = por %p647_p10, %p646_p9 }
 0x1cf   : > { %p644_p8 = pneg %p643_p7 }
 0x1d0   : > { %p650_p13 = por %p649_p12, %p648_p11 }
 0x1d2   : > { %p651_p0 = pnand %p650_p13, %p644_p8 }
 0x1d4   : > { %654 = shalt.err (!%p651_p0)
}
 0x1d5   : > { %585 = dma.vmem_to_hbm [thread:$0]  (%p763_p5), %s852_s10, 128, %s850_s13, %s402_s14  }
 0x1d6 PF: > { %p591_p1 = scmp.ge.s32.totalorder %s689_s21, 2  ;;  %s427_s8 = sand.u32 1, %s677_s18  }
 0x1d7   : > { %s428_s9 = scalar_lea.sflag [#allocation3], %s427_s8 }
 0x1d8   : > { %p588_p2 = pnand %p591_p1, %p767_p6 }
 0x1da   : > { %672 = dma.done.wait (!%p588_p2), %s428_s9, 128  }
 0x1db   : > { %674 = vsyncadd (!%p588_p2), %s428_s9, 4294967168  ;;  %p15_p3 = scmp.ge.s32.totalorder %s750_s24, 4   ;;  %s901_s18 = smov %s681_s19 }
 0x1dc   : > { %s902_s19 = smov %s685_s20  ;;  %s903_s20 = smov %s761_s27 }
 0x1dd   : > { %s904_s21 = smov %s750_s24  ;;  %17 = sbr.rel (!%p15_p3) target bundleno = 3 (0x3), region = 75 }
 0x1e4   :  { %433 = vsyncpa [#allocation3], 1 }
 0x1e5   :  { %435 = vsyncpa [#allocation3 + $0x1], 1 }

</bundles_post_ra>
